<compile_context>
chip_gen: v6e
topology: v6e:2x2x1
jax: 0.10.0
libtpu: 0.0.40
codegen_flags: <defaults>
</compile_context>

<pallas_src>
import math
import jax
import jax.numpy as jnp
from jax.experimental import pallas as pl
from jax.experimental.pallas import tpu as pltpu

PI = math.pi


# ----------------------------- Pallas kernel --------------------------------
def quantum_s4_kernel(x_ref, lpos_ref, w_pre_ref, b_pre_ref, k_ref, d_ref,
                      w_val_ref, b_val_ref, w_gate_ref, b_gate_ref,
                      w_head_ref, b_head_ref, out_ref):
    x = x_ref[...]                                   # (Din, R)  tokens on lanes
    lpos = lpos_ref[...]                             # (1, R)    token position within its sequence

    # ---- Pre_S4_Lin:  h = W_pre @ x + b -------------------------------------
    # NOTE: cast matmul LHS/RHS to bf16 (keep f32 accumulation) once H/L grow;
    # at H=32, L=9 the f32 matmuls are nowhere near the MXU roofline.
    h = jnp.dot(w_pre_ref[...], x,
                preferred_element_type=jnp.float32) + b_pre_ref[...]      # (H, R)

    # ---- S4 (S4D-style): causal depthwise SSM conv + D*u --------------------
    #   y[c, r] = sum_lag [lpos[r] >= lag] * K[c, lag] * h[c, r - lag] + D[c] * h[c, r]
    # Static lag loop: pure VPU accumulation, only (H, L) of K resident.  The
    # lpos mask kills non-causal taps AND cross-sequence taps (every block holds
    # whole sequences), so the zero-padded lane shift never leaks across batches.
    k = k_ref[...]                                   # (H, L)   lag kernel
    H, R = h.shape
    L = k.shape[1]
    y = (d_ref[...] + k[:, 0:1]) * h                 # lag-0 tap + D skip
    zpad = jnp.zeros((H, L), dtype=jnp.float32)
    for lag in range(1, L):
        h_shift = jnp.concatenate([zpad[:, :lag], h[:, :R - lag]], axis=1)
        h_shift = jnp.where(lpos >= float(lag), h_shift, 0.0)
        y = y + k[:, lag:lag + 1] * h_shift

    # GELU (tanh approximation)
    # TODO(synk): PyTorch nn.GELU / S4Block default is exact erf GELU.
    c = math.sqrt(2.0 / math.pi)
    y = 0.5 * y * (1.0 + jnp.tanh(c * (y + 0.044715 * y * y * y)))

    # ---- output Linear(H, 2H) + GLU, value/gate as separate matmuls ---------
    z_val = jnp.dot(w_val_ref[...], y,
                    preferred_element_type=jnp.float32) + b_val_ref[...]  # (H, R)
    z_gate = jnp.dot(w_gate_ref[...], y,
                     preferred_element_type=jnp.float32) + b_gate_ref[...]
    e = jnp.exp(-jnp.abs(z_gate))                    # numerically-safe exact sigmoid
    sig = jnp.where(z_gate >= 0.0, 1.0 / (1.0 + e), e / (1.0 + e))
    s = z_val * sig                                  # (H, R)

    # ---- fused Amp/Phase head: one (2P, H) x (H, R) matmul ------------------
    zh = jnp.dot(w_head_ref[...], s,
                 preferred_element_type=jnp.float32) + b_head_ref[...]    # (2P, R)
    P = zh.shape[0] // 2

    # log_softmax over the P amp rows (tiny static sublane loop; no cross-
    # sublane reduce op needed at these sizes)
    m = zh[0:1, :]
    for p in range(1, P):
        m = jnp.maximum(m, zh[p:p + 1, :])
    ssum = jnp.exp(zh[0:1, :] - m)
    for p in range(1, P):
        ssum = ssum + jnp.exp(zh[p:p + 1, :] - m)
    lse = m + jnp.log(ssum)                          # (1, R)
    amp_full = zh - lse

    # softsign phase:  2*pi*(1 + x / (1 + |x|))   (exact division)
    phase_full = 2.0 * PI * (1.0 + zh / (1.0 + jnp.abs(zh)))

    # merge amp rows / phase rows with a sublane select -> single lane-dense store
    row = jax.lax.broadcasted_iota(jnp.int32, zh.shape, 0)
    out_ref[...] = jnp.where(row < P, amp_full, phase_full)


def _full(shape):
    n = len(shape)
    return pl.BlockSpec(shape, lambda *_: (0,) * n)


def quantum_s4_forward(src_blf, params, batch_tile=None):
    """src_blf: (B, L, input_dim) float32 -> (amp, phase), each (B, L, phys_dim)."""
    B, L, Din = src_blf.shape
    H = params["w_pre_t"].shape[0]
    P2 = params["w_head_t"].shape[0]                 # 2 * phys_dim
    P = P2 // 2
    R = B * L

    # Feature-major layout: rows = features (sublanes), cols = B*L tokens (lanes).
    x_t = src_blf.reshape(R, Din).T                  # (Din, R)
    lpos = jnp.tile(jnp.arange(L, dtype=jnp.float32), B).reshape(1, R)

    # Grid split (feedback): only pay an extra ~600-cycle grid step when each
    # block's work clearly amortizes it, and only when the lane-axis block is a
    # multiple of 128 (Mosaic (8,128) block constraint).  At toy sizes -> grid=(1,).
    if batch_tile is None:
        bt = B // 2
        if B % 2 == 0 and bt * L * H >= 32768 and (bt * L) % 128 == 0:
            batch_tile = bt
        else:
            batch_tile = B
    assert B % batch_tile == 0
    assert batch_tile == B or (batch_tile * L) % 128 == 0, \
        "lane-axis blocks must be 128-aligned"
    tile_r = batch_tile * L
    n_blocks = R // tile_r

    grid_spec = pltpu.PrefetchScalarGridSpec(
        num_scalar_prefetch=0,
        grid=(n_blocks,),
        in_specs=[
            pl.BlockSpec((Din, tile_r), lambda i: (0, i)),   # x_t
            pl.BlockSpec((1, tile_r), lambda i: (0, i)),     # lpos
            _full((H, Din)), _full((H, 1)),                  # pre linear
            _full((H, L)), _full((H, 1)),                    # SSM kernel + D skip
            _full((H, H)), _full((H, 1)),                    # GLU value
            _full((H, H)), _full((H, 1)),                    # GLU gate
            _full((P2, H)), _full((P2, 1)),                  # fused head
        ],
        out_specs=pl.BlockSpec((P2, tile_r), lambda i: (0, i)),
    )
    out = pl.pallas_call(
        quantum_s4_kernel,
        out_shape=jax.ShapeDtypeStruct((P2, R), jnp.float32),
        grid_spec=grid_spec,
        compiler_params=pltpu.CompilerParams(dimension_semantics=("parallel",)),
    )(x_t, lpos, params["w_pre_t"], params["b_pre_t"], params["k_lag"],
      params["d_t"], params["w_val_t"], params["b_val_t"],
      params["w_gate_t"], params["b_gate_t"],
      params["w_head_t"], params["b_head_t"])

    amp = out[:P].reshape(P, B, L).transpose(1, 2, 0)      # (B, L, P)
    phase = out[P:].reshape(P, B, L).transpose(1, 2, 0)    # (B, L, P)
    return amp, phase


# ------------------------------ JAX glue -------------------------------------
def make_salt(system_size, param, n_dim, param_encoding):
    if n_dim == 1:
        parity = (jnp.array([1, 0]) - system_size) % 2
    else:
        parity = jnp.concatenate([(jnp.array([1, 0]) - system_size[0]) % 2,
                                  (jnp.array([1, 0]) - system_size[1]) % 2])
    log_size = jnp.log(system_size.astype(jnp.float32))
    size_enc = jnp.stack([log_size[i] ** j
                          for i in range(log_size.shape[0])
                          for j in range(1, param_encoding + 1)])
    param_enc = jnp.stack([param[i] ** j
                           for i in range(param.shape[0])
                           for j in range(1, param_encoding + 1)])
    return jnp.concatenate([parity.astype(jnp.float32), size_enc, param_enc])


def wrap_spins(spins, salt, phys_dim):
    n, batch = spins.shape
    input_dim = phys_dim + salt.shape[0]
    src = jnp.zeros((n + 1, batch, input_dim), jnp.float32)
    one_hot = jax.nn.one_hot(spins.astype(jnp.int32), phys_dim, dtype=jnp.float32)
    src = src.at[1:, :, :phys_dim].set(one_hot)
    src = src.at[:, :, phys_dim:].set(
        jnp.broadcast_to(salt, (n + 1, batch, salt.shape[0])))
    return src


def make_params(key, input_dim, hidden, phys_dim, L, state_size=16):
    ks = jax.random.split(key, 12)

    def linear_init(kw, kb, fan_in, fan_out):
        bound = 1.0 / math.sqrt(fan_in)
        w = jax.random.uniform(kw, (fan_in, fan_out), jnp.float32, -bound, bound)
        b = jax.random.uniform(kb, (1, fan_out), jnp.float32, -bound, bound)
        return w, b

    w_pre, b_pre = linear_init(ks[0], ks[1], input_dim, hidden)
    w_out, b_out = linear_init(ks[2], ks[3], hidden, 2 * hidden)
    w_amp, b_amp = linear_init(ks[4], ks[5], hidden, phys_dim)
    w_ph, b_ph = linear_init(ks[6], ks[7], hidden, phys_dim)

    # S4D-Lin diagonal SSM kernel (plain-JAX glue; the conv runs in the kernel).
    n_state = jnp.arange(state_size, dtype=jnp.float32)
    A = -0.5 + 1j * math.pi * n_state                                 # (N,)
    log_dt = jax.random.uniform(ks[8], (hidden,), jnp.float32,
                                math.log(1e-3), math.log(1e-1))
    dt = jnp.exp(log_dt)                                              # (H,)
    C = (jax.random.normal(ks[9], (hidden, state_size)) +
         1j * jax.random.normal(ks[10], (hidden, state_size))) * math.sqrt(0.5)
    dtA = dt[:, None] * A[None, :]                                    # (H, N)
    dA = jnp.exp(dtA)
    dB = (dA - 1.0) / A[None, :]                                      # ZOH, B = 1
    l = jnp.arange(L, dtype=jnp.float32)
    vand = jnp.exp(dtA[:, :, None] * l[None, None, :])                # (H, N, L)
    K = 2.0 * jnp.real(jnp.einsum('hn,hn,hnl->hl', C, dB, vand))      # (H, L): lag on lanes
    d_skip = jax.random.normal(ks[11], (hidden, 1), jnp.float32)      # (H, 1)

    # Fused head weights (amp || phase) -> one matmul / one lane-dense store.
    w_head = jnp.concatenate([w_amp, w_ph], axis=1)                   # (H, 2P)
    b_head = jnp.concatenate([b_amp, b_ph], axis=1)                   # (1, 2P)

    # All weights stored pre-transposed for the feature-major kernel layout.
    return dict(
        w_pre_t=w_pre.T, b_pre_t=b_pre.T,                 # (H, Din), (H, 1)
        k_lag=K.astype(jnp.float32),                      # (H, L)
        d_t=d_skip,                                       # (H, 1)
        w_val_t=w_out[:, :hidden].T, b_val_t=b_out[:, :hidden].T,     # (H, H), (H, 1)
        w_gate_t=w_out[:, hidden:].T, b_gate_t=b_out[:, hidden:].T,   # (H, H), (H, 1)
        w_head_t=w_head.T, b_head_t=b_head.T,             # (2P, H), (2P, 1)
    )


# ------------------------------- main ----------------------------------------
if __name__ == "__main__":
    key = jax.random.PRNGKey(0)
    k_spins, k_params = jax.random.split(key, 2)

    # module hyperparameters (small, consistent with the PyTorch __init__)
    system_sizes = [[8]]            # n_size = 1, n_dim = 1 -> n = 8 spins
    param_dim = 1
    param_encoding = 1
    phys_dim = 2
    hidden_size = 32
    n_dim = 1
    n = 8
    batch = 4
    salt_len = (n_dim + param_dim) * param_encoding + 2 * n_dim      # = 4
    input_dim = salt_len + phys_dim                                   # = 6
    L = n + 1

    # set_param equivalent (deterministic)
    param = jnp.array([1.0], jnp.float32)
    system_size = jnp.array(system_sizes[0], jnp.int32)
    salt = make_salt(system_size, param, n_dim, param_encoding)

    # spins: (n, batch) in {0, 1}
    spins = jax.random.bernoulli(k_spins, 0.5, (n, batch)).astype(jnp.float32)
    src = wrap_spins(spins, salt, phys_dim)          # (L, batch, input_dim)
    src_blf = jnp.transpose(src, (1, 0, 2))          # (batch, L, input_dim)

    params = make_params(k_params, input_dim, hidden_size, phys_dim, L)

    amp_blp, phase_blp = quantum_s4_forward(src_blf, params)
    amp = jnp.transpose(amp_blp, (1, 0, 2))          # (L, batch, phys_dim)
    phase = jnp.transpose(phase_blp, (1, 0, 2))      # (L, batch, phys_dim)

    jax.block_until_ready((amp, phase))
    assert amp.shape == (L, batch, phys_dim) and phase.shape == (L, batch, phys_dim)
    assert bool(jnp.all(jnp.isfinite(amp))) and bool(jnp.all(jnp.isfinite(phase)))
    print("KERNEL_OK")
</pallas_src>

<mosaic_0001>
module attributes {stable_mosaic.version = 11 : i64} {
  func.func @quantum_s4_kernel(%arg0: i32, %arg1: memref<6x36xf32, #tpu.memory_space<vmem>>, %arg2: memref<1x36xf32, #tpu.memory_space<vmem>>, %arg3: memref<32x6xf32, #tpu.memory_space<vmem>>, %arg4: memref<32x1xf32, #tpu.memory_space<vmem>>, %arg5: memref<32x9xf32, #tpu.memory_space<vmem>>, %arg6: memref<32x1xf32, #tpu.memory_space<vmem>>, %arg7: memref<32x32xf32, #tpu.memory_space<vmem>>, %arg8: memref<32x1xf32, #tpu.memory_space<vmem>>, %arg9: memref<32x32xf32, #tpu.memory_space<vmem>>, %arg10: memref<32x1xf32, #tpu.memory_space<vmem>>, %arg11: memref<4x32xf32, #tpu.memory_space<vmem>>, %arg12: memref<4x1xf32, #tpu.memory_space<vmem>>, %arg13: memref<4x36xf32, #tpu.memory_space<vmem>>) attributes {dimension_semantics = [#tpu.dimension_semantics<parallel>], iteration_bounds = array<i64: 1>, scalar_prefetch = 0 : i64, scratch_operands = 0 : i64, tpu.core_type = #tpu.core_type<tc>, window_params = [{transform_indices = @transform_0, window_bounds = array<i64: 6, 36>}, {transform_indices = @transform_1, window_bounds = array<i64: 1, 36>}, {pipeline_mode = #tpu.pipeline_mode<synchronous>, transform_indices = @transform_2, window_bounds = array<i64: 32, 6>}, {pipeline_mode = #tpu.pipeline_mode<synchronous>, transform_indices = @transform_3, window_bounds = array<i64: 32, 1>}, {pipeline_mode = #tpu.pipeline_mode<synchronous>, transform_indices = @transform_4, window_bounds = array<i64: 32, 9>}, {pipeline_mode = #tpu.pipeline_mode<synchronous>, transform_indices = @transform_5, window_bounds = array<i64: 32, 1>}, {pipeline_mode = #tpu.pipeline_mode<synchronous>, transform_indices = @transform_6, window_bounds = array<i64: 32, 32>}, {pipeline_mode = #tpu.pipeline_mode<synchronous>, transform_indices = @transform_7, window_bounds = array<i64: 32, 1>}, {pipeline_mode = #tpu.pipeline_mode<synchronous>, transform_indices = @transform_8, window_bounds = array<i64: 32, 32>}, {pipeline_mode = #tpu.pipeline_mode<synchronous>, transform_indices = @transform_9, window_bounds = array<i64: 32, 1>}, {pipeline_mode = #tpu.pipeline_mode<synchronous>, transform_indices = @transform_10, window_bounds = array<i64: 4, 32>}, {pipeline_mode = #tpu.pipeline_mode<synchronous>, transform_indices = @transform_11, window_bounds = array<i64: 4, 1>}, {transform_indices = @transform_12, window_bounds = array<i64: 4, 36>}]} {
    %c0 = arith.constant 0 : index
    %c0_0 = arith.constant 0 : index
    %0 = vector.load %arg1[%c0, %c0_0] : memref<6x36xf32, #tpu.memory_space<vmem>>, vector<6x36xf32>
    %c0_1 = arith.constant 0 : index
    %c0_2 = arith.constant 0 : index
    %1 = vector.load %arg2[%c0_1, %c0_2] : memref<1x36xf32, #tpu.memory_space<vmem>>, vector<1x36xf32>
    %c0_3 = arith.constant 0 : index
    %c0_4 = arith.constant 0 : index
    %2 = vector.load %arg3[%c0_3, %c0_4] : memref<32x6xf32, #tpu.memory_space<vmem>>, vector<32x6xf32>
    %cst = arith.constant dense<0.000000e+00> : vector<32x36xf32>
    %3 = tpu.matmul %2, %0, %cst {dimension_numbers = #tpu.dot_dimension_numbers<[1], [0], [0], [1], [0, 0, 1, 1], [], []>} : vector<32x6xf32>, vector<6x36xf32>, vector<32x36xf32> -> vector<32x36xf32>
    %c0_5 = arith.constant 0 : index
    %c0_6 = arith.constant 0 : index
    %4 = vector.load %arg4[%c0_5, %c0_6] : memref<32x1xf32, #tpu.memory_space<vmem>>, vector<32x1xf32>
    %5 = vector.broadcast %4 : vector<32x1xf32> to vector<32x36xf32>
    %6 = arith.addf %3, %5 : vector<32x36xf32>
    %c0_7 = arith.constant 0 : index
    %c0_8 = arith.constant 0 : index
    %7 = vector.load %arg5[%c0_7, %c0_8] : memref<32x9xf32, #tpu.memory_space<vmem>>, vector<32x9xf32>
    %c0_9 = arith.constant 0 : index
    %c0_10 = arith.constant 0 : index
    %8 = vector.load %arg6[%c0_9, %c0_10] : memref<32x1xf32, #tpu.memory_space<vmem>>, vector<32x1xf32>
    %9 = vector.extract_strided_slice %7 {offsets = [0, 0], sizes = [32, 1], strides = [1, 1]} : vector<32x9xf32> to vector<32x1xf32>
    %10 = arith.addf %8, %9 : vector<32x1xf32>
    %11 = vector.broadcast %10 : vector<32x1xf32> to vector<32x36xf32>
    %12 = arith.mulf %11, %6 : vector<32x36xf32>
    %cst_11 = arith.constant 0.000000e+00 : f32
    %13 = vector.broadcast %cst_11 : f32 to vector<32x9xf32>
    %14 = vector.extract_strided_slice %13 {offsets = [0, 0], sizes = [32, 1], strides = [1, 1]} : vector<32x9xf32> to vector<32x1xf32>
    %15 = vector.extract_strided_slice %6 {offsets = [0, 0], sizes = [32, 35], strides = [1, 1]} : vector<32x36xf32> to vector<32x35xf32>
    %16 = tpu.concatenate %14, %15 in 1 : vector<32x1xf32>, vector<32x35xf32> -> vector<32x36xf32>
    %cst_12 = arith.constant 1.000000e+00 : f32
    %17 = vector.broadcast %cst_12 : f32 to vector<1x36xf32>
    %18 = arith.cmpf oge, %1, %17 : vector<1x36xf32>
    %cst_13 = arith.constant 0.000000e+00 : f32
    %19 = vector.shape_cast %18 : vector<1x36xi1> to vector<1x36xi1>
    %20 = vector.broadcast %19 : vector<1x36xi1> to vector<32x36xi1>
    %21 = vector.broadcast %cst_13 : f32 to vector<32x36xf32>
    %22 = arith.select %20, %16, %21 : vector<32x36xi1>, vector<32x36xf32>
    %23 = vector.extract_strided_slice %7 {offsets = [0, 1], sizes = [32, 1], strides = [1, 1]} : vector<32x9xf32> to vector<32x1xf32>
    %24 = vector.broadcast %23 : vector<32x1xf32> to vector<32x36xf32>
    %25 = arith.mulf %24, %22 : vector<32x36xf32>
    %26 = arith.addf %12, %25 : vector<32x36xf32>
    %27 = vector.extract_strided_slice %13 {offsets = [0, 0], sizes = [32, 2], strides = [1, 1]} : vector<32x9xf32> to vector<32x2xf32>
    %28 = vector.extract_strided_slice %6 {offsets = [0, 0], sizes = [32, 34], strides = [1, 1]} : vector<32x36xf32> to vector<32x34xf32>
    %29 = tpu.concatenate %27, %28 in 1 : vector<32x2xf32>, vector<32x34xf32> -> vector<32x36xf32>
    %cst_14 = arith.constant 2.000000e+00 : f32
    %30 = vector.broadcast %cst_14 : f32 to vector<1x36xf32>
    %31 = arith.cmpf oge, %1, %30 : vector<1x36xf32>
    %cst_15 = arith.constant 0.000000e+00 : f32
    %32 = vector.shape_cast %31 : vector<1x36xi1> to vector<1x36xi1>
    %33 = vector.broadcast %32 : vector<1x36xi1> to vector<32x36xi1>
    %34 = vector.broadcast %cst_15 : f32 to vector<32x36xf32>
    %35 = arith.select %33, %29, %34 : vector<32x36xi1>, vector<32x36xf32>
    %36 = vector.extract_strided_slice %7 {offsets = [0, 2], sizes = [32, 1], strides = [1, 1]} : vector<32x9xf32> to vector<32x1xf32>
    %37 = vector.broadcast %36 : vector<32x1xf32> to vector<32x36xf32>
    %38 = arith.mulf %37, %35 : vector<32x36xf32>
    %39 = arith.addf %26, %38 : vector<32x36xf32>
    %40 = vector.extract_strided_slice %13 {offsets = [0, 0], sizes = [32, 3], strides = [1, 1]} : vector<32x9xf32> to vector<32x3xf32>
    %41 = vector.extract_strided_slice %6 {offsets = [0, 0], sizes = [32, 33], strides = [1, 1]} : vector<32x36xf32> to vector<32x33xf32>
    %42 = tpu.concatenate %40, %41 in 1 : vector<32x3xf32>, vector<32x33xf32> -> vector<32x36xf32>
    %cst_16 = arith.constant 3.000000e+00 : f32
    %43 = vector.broadcast %cst_16 : f32 to vector<1x36xf32>
    %44 = arith.cmpf oge, %1, %43 : vector<1x36xf32>
    %cst_17 = arith.constant 0.000000e+00 : f32
    %45 = vector.shape_cast %44 : vector<1x36xi1> to vector<1x36xi1>
    %46 = vector.broadcast %45 : vector<1x36xi1> to vector<32x36xi1>
    %47 = vector.broadcast %cst_17 : f32 to vector<32x36xf32>
    %48 = arith.select %46, %42, %47 : vector<32x36xi1>, vector<32x36xf32>
    %49 = vector.extract_strided_slice %7 {offsets = [0, 3], sizes = [32, 1], strides = [1, 1]} : vector<32x9xf32> to vector<32x1xf32>
    %50 = vector.broadcast %49 : vector<32x1xf32> to vector<32x36xf32>
    %51 = arith.mulf %50, %48 : vector<32x36xf32>
    %52 = arith.addf %39, %51 : vector<32x36xf32>
    %53 = vector.extract_strided_slice %13 {offsets = [0, 0], sizes = [32, 4], strides = [1, 1]} : vector<32x9xf32> to vector<32x4xf32>
    %54 = vector.extract_strided_slice %6 {offsets = [0, 0], sizes = [32, 32], strides = [1, 1]} : vector<32x36xf32> to vector<32x32xf32>
    %55 = tpu.concatenate %53, %54 in 1 : vector<32x4xf32>, vector<32x32xf32> -> vector<32x36xf32>
    %cst_18 = arith.constant 4.000000e+00 : f32
    %56 = vector.broadcast %cst_18 : f32 to vector<1x36xf32>
    %57 = arith.cmpf oge, %1, %56 : vector<1x36xf32>
    %cst_19 = arith.constant 0.000000e+00 : f32
    %58 = vector.shape_cast %57 : vector<1x36xi1> to vector<1x36xi1>
    %59 = vector.broadcast %58 : vector<1x36xi1> to vector<32x36xi1>
    %60 = vector.broadcast %cst_19 : f32 to vector<32x36xf32>
    %61 = arith.select %59, %55, %60 : vector<32x36xi1>, vector<32x36xf32>
    %62 = vector.extract_strided_slice %7 {offsets = [0, 4], sizes = [32, 1], strides = [1, 1]} : vector<32x9xf32> to vector<32x1xf32>
    %63 = vector.broadcast %62 : vector<32x1xf32> to vector<32x36xf32>
    %64 = arith.mulf %63, %61 : vector<32x36xf32>
    %65 = arith.addf %52, %64 : vector<32x36xf32>
    %66 = vector.extract_strided_slice %13 {offsets = [0, 0], sizes = [32, 5], strides = [1, 1]} : vector<32x9xf32> to vector<32x5xf32>
    %67 = vector.extract_strided_slice %6 {offsets = [0, 0], sizes = [32, 31], strides = [1, 1]} : vector<32x36xf32> to vector<32x31xf32>
    %68 = tpu.concatenate %66, %67 in 1 : vector<32x5xf32>, vector<32x31xf32> -> vector<32x36xf32>
    %cst_20 = arith.constant 5.000000e+00 : f32
    %69 = vector.broadcast %cst_20 : f32 to vector<1x36xf32>
    %70 = arith.cmpf oge, %1, %69 : vector<1x36xf32>
    %cst_21 = arith.constant 0.000000e+00 : f32
    %71 = vector.shape_cast %70 : vector<1x36xi1> to vector<1x36xi1>
    %72 = vector.broadcast %71 : vector<1x36xi1> to vector<32x36xi1>
    %73 = vector.broadcast %cst_21 : f32 to vector<32x36xf32>
    %74 = arith.select %72, %68, %73 : vector<32x36xi1>, vector<32x36xf32>
    %75 = vector.extract_strided_slice %7 {offsets = [0, 5], sizes = [32, 1], strides = [1, 1]} : vector<32x9xf32> to vector<32x1xf32>
    %76 = vector.broadcast %75 : vector<32x1xf32> to vector<32x36xf32>
    %77 = arith.mulf %76, %74 : vector<32x36xf32>
    %78 = arith.addf %65, %77 : vector<32x36xf32>
    %79 = vector.extract_strided_slice %13 {offsets = [0, 0], sizes = [32, 6], strides = [1, 1]} : vector<32x9xf32> to vector<32x6xf32>
    %80 = vector.extract_strided_slice %6 {offsets = [0, 0], sizes = [32, 30], strides = [1, 1]} : vector<32x36xf32> to vector<32x30xf32>
    %81 = tpu.concatenate %79, %80 in 1 : vector<32x6xf32>, vector<32x30xf32> -> vector<32x36xf32>
    %cst_22 = arith.constant 6.000000e+00 : f32
    %82 = vector.broadcast %cst_22 : f32 to vector<1x36xf32>
    %83 = arith.cmpf oge, %1, %82 : vector<1x36xf32>
    %cst_23 = arith.constant 0.000000e+00 : f32
    %84 = vector.shape_cast %83 : vector<1x36xi1> to vector<1x36xi1>
    %85 = vector.broadcast %84 : vector<1x36xi1> to vector<32x36xi1>
    %86 = vector.broadcast %cst_23 : f32 to vector<32x36xf32>
    %87 = arith.select %85, %81, %86 : vector<32x36xi1>, vector<32x36xf32>
    %88 = vector.extract_strided_slice %7 {offsets = [0, 6], sizes = [32, 1], strides = [1, 1]} : vector<32x9xf32> to vector<32x1xf32>
    %89 = vector.broadcast %88 : vector<32x1xf32> to vector<32x36xf32>
    %90 = arith.mulf %89, %87 : vector<32x36xf32>
    %91 = arith.addf %78, %90 : vector<32x36xf32>
    %92 = vector.extract_strided_slice %13 {offsets = [0, 0], sizes = [32, 7], strides = [1, 1]} : vector<32x9xf32> to vector<32x7xf32>
    %93 = vector.extract_strided_slice %6 {offsets = [0, 0], sizes = [32, 29], strides = [1, 1]} : vector<32x36xf32> to vector<32x29xf32>
    %94 = tpu.concatenate %92, %93 in 1 : vector<32x7xf32>, vector<32x29xf32> -> vector<32x36xf32>
    %cst_24 = arith.constant 7.000000e+00 : f32
    %95 = vector.broadcast %cst_24 : f32 to vector<1x36xf32>
    %96 = arith.cmpf oge, %1, %95 : vector<1x36xf32>
    %cst_25 = arith.constant 0.000000e+00 : f32
    %97 = vector.shape_cast %96 : vector<1x36xi1> to vector<1x36xi1>
    %98 = vector.broadcast %97 : vector<1x36xi1> to vector<32x36xi1>
    %99 = vector.broadcast %cst_25 : f32 to vector<32x36xf32>
    %100 = arith.select %98, %94, %99 : vector<32x36xi1>, vector<32x36xf32>
    %101 = vector.extract_strided_slice %7 {offsets = [0, 7], sizes = [32, 1], strides = [1, 1]} : vector<32x9xf32> to vector<32x1xf32>
    %102 = vector.broadcast %101 : vector<32x1xf32> to vector<32x36xf32>
    %103 = arith.mulf %102, %100 : vector<32x36xf32>
    %104 = arith.addf %91, %103 : vector<32x36xf32>
    %105 = vector.extract_strided_slice %13 {offsets = [0, 0], sizes = [32, 8], strides = [1, 1]} : vector<32x9xf32> to vector<32x8xf32>
    %106 = vector.extract_strided_slice %6 {offsets = [0, 0], sizes = [32, 28], strides = [1, 1]} : vector<32x36xf32> to vector<32x28xf32>
    %107 = tpu.concatenate %105, %106 in 1 : vector<32x8xf32>, vector<32x28xf32> -> vector<32x36xf32>
    %cst_26 = arith.constant 8.000000e+00 : f32
    %108 = vector.broadcast %cst_26 : f32 to vector<1x36xf32>
    %109 = arith.cmpf oge, %1, %108 : vector<1x36xf32>
    %cst_27 = arith.constant 0.000000e+00 : f32
    %110 = vector.shape_cast %109 : vector<1x36xi1> to vector<1x36xi1>
    %111 = vector.broadcast %110 : vector<1x36xi1> to vector<32x36xi1>
    %112 = vector.broadcast %cst_27 : f32 to vector<32x36xf32>
    %113 = arith.select %111, %107, %112 : vector<32x36xi1>, vector<32x36xf32>
    %114 = vector.extract_strided_slice %7 {offsets = [0, 8], sizes = [32, 1], strides = [1, 1]} : vector<32x9xf32> to vector<32x1xf32>
    %115 = vector.broadcast %114 : vector<32x1xf32> to vector<32x36xf32>
    %116 = arith.mulf %115, %113 : vector<32x36xf32>
    %117 = arith.addf %104, %116 : vector<32x36xf32>
    %cst_28 = arith.constant 5.000000e-01 : f32
    %118 = vector.broadcast %cst_28 : f32 to vector<32x36xf32>
    %119 = arith.mulf %118, %117 : vector<32x36xf32>
    %cst_29 = arith.constant 4.471500e-02 : f32
    %120 = vector.broadcast %cst_29 : f32 to vector<32x36xf32>
    %121 = arith.mulf %120, %117 : vector<32x36xf32>
    %122 = arith.mulf %121, %117 : vector<32x36xf32>
    %123 = arith.mulf %122, %117 : vector<32x36xf32>
    %124 = arith.addf %117, %123 : vector<32x36xf32>
    %cst_30 = arith.constant 0.797884583 : f32
    %125 = vector.broadcast %cst_30 : f32 to vector<32x36xf32>
    %126 = arith.mulf %125, %124 : vector<32x36xf32>
    %127 = math.tanh %126 : vector<32x36xf32>
    %cst_31 = arith.constant 1.000000e+00 : f32
    %128 = vector.broadcast %cst_31 : f32 to vector<32x36xf32>
    %129 = arith.addf %128, %127 : vector<32x36xf32>
    %130 = arith.mulf %119, %129 : vector<32x36xf32>
    %c0_32 = arith.constant 0 : index
    %c0_33 = arith.constant 0 : index
    %131 = vector.load %arg7[%c0_32, %c0_33] : memref<32x32xf32, #tpu.memory_space<vmem>>, vector<32x32xf32>
    %cst_34 = arith.constant dense<0.000000e+00> : vector<32x36xf32>
    %132 = tpu.matmul %131, %130, %cst_34 {dimension_numbers = #tpu.dot_dimension_numbers<[1], [0], [0], [1], [0, 0, 1, 1], [], []>} : vector<32x32xf32>, vector<32x36xf32>, vector<32x36xf32> -> vector<32x36xf32>
    %c0_35 = arith.constant 0 : index
    %c0_36 = arith.constant 0 : index
    %133 = vector.load %arg8[%c0_35, %c0_36] : memref<32x1xf32, #tpu.memory_space<vmem>>, vector<32x1xf32>
    %134 = vector.broadcast %133 : vector<32x1xf32> to vector<32x36xf32>
    %135 = arith.addf %132, %134 : vector<32x36xf32>
    %c0_37 = arith.constant 0 : index
    %c0_38 = arith.constant 0 : index
    %136 = vector.load %arg9[%c0_37, %c0_38] : memref<32x32xf32, #tpu.memory_space<vmem>>, vector<32x32xf32>
    %cst_39 = arith.constant dense<0.000000e+00> : vector<32x36xf32>
    %137 = tpu.matmul %136, %130, %cst_39 {dimension_numbers = #tpu.dot_dimension_numbers<[1], [0], [0], [1], [0, 0, 1, 1], [], []>} : vector<32x32xf32>, vector<32x36xf32>, vector<32x36xf32> -> vector<32x36xf32>
    %c0_40 = arith.constant 0 : index
    %c0_41 = arith.constant 0 : index
    %138 = vector.load %arg10[%c0_40, %c0_41] : memref<32x1xf32, #tpu.memory_space<vmem>>, vector<32x1xf32>
    %139 = vector.broadcast %138 : vector<32x1xf32> to vector<32x36xf32>
    %140 = arith.addf %137, %139 : vector<32x36xf32>
    %141 = math.absf %140 : vector<32x36xf32>
    %cst_42 = arith.constant 0.000000e+00 : f32
    %142 = vector.broadcast %cst_42 : f32 to vector<32x36xf32>
    %143 = arith.subf %142, %141 : vector<32x36xf32>
    %144 = math.exp %143 : vector<32x36xf32>
    %cst_43 = arith.constant 0.000000e+00 : f32
    %145 = vector.broadcast %cst_43 : f32 to vector<32x36xf32>
    %146 = arith.cmpf oge, %140, %145 : vector<32x36xf32>
    %cst_44 = arith.constant 1.000000e+00 : f32
    %147 = vector.broadcast %cst_44 : f32 to vector<32x36xf32>
    %148 = arith.addf %147, %144 : vector<32x36xf32>
    %cst_45 = arith.constant 1.000000e+00 : f32
    %149 = vector.broadcast %cst_45 : f32 to vector<32x36xf32>
    %150 = arith.divf %149, %148 : vector<32x36xf32>
    %cst_46 = arith.constant 1.000000e+00 : f32
    %151 = vector.broadcast %cst_46 : f32 to vector<32x36xf32>
    %152 = arith.addf %151, %144 : vector<32x36xf32>
    %153 = arith.divf %144, %152 : vector<32x36xf32>
    %154 = arith.select %146, %150, %153 : vector<32x36xi1>, vector<32x36xf32>
    %155 = arith.mulf %135, %154 : vector<32x36xf32>
    %c0_47 = arith.constant 0 : index
    %c0_48 = arith.constant 0 : index
    %156 = vector.load %arg11[%c0_47, %c0_48] : memref<4x32xf32, #tpu.memory_space<vmem>>, vector<4x32xf32>
    %cst_49 = arith.constant dense<0.000000e+00> : vector<4x36xf32>
    %157 = tpu.matmul %156, %155, %cst_49 {dimension_numbers = #tpu.dot_dimension_numbers<[1], [0], [0], [1], [0, 0, 1, 1], [], []>} : vector<4x32xf32>, vector<32x36xf32>, vector<4x36xf32> -> vector<4x36xf32>
    %c0_50 = arith.constant 0 : index
    %c0_51 = arith.constant 0 : index
    %158 = vector.load %arg12[%c0_50, %c0_51] : memref<4x1xf32, #tpu.memory_space<vmem>>, vector<4x1xf32>
    %159 = vector.broadcast %158 : vector<4x1xf32> to vector<4x36xf32>
    %160 = arith.addf %157, %159 : vector<4x36xf32>
    %161 = vector.extract_strided_slice %160 {offsets = [0, 0], sizes = [1, 36], strides = [1, 1]} : vector<4x36xf32> to vector<1x36xf32>
    %162 = vector.extract_strided_slice %160 {offsets = [1, 0], sizes = [1, 36], strides = [1, 1]} : vector<4x36xf32> to vector<1x36xf32>
    %163 = arith.maximumf %161, %162 : vector<1x36xf32>
    %164 = vector.extract_strided_slice %160 {offsets = [0, 0], sizes = [1, 36], strides = [1, 1]} : vector<4x36xf32> to vector<1x36xf32>
    %165 = arith.subf %164, %163 : vector<1x36xf32>
    %166 = math.exp %165 : vector<1x36xf32>
    %167 = vector.extract_strided_slice %160 {offsets = [1, 0], sizes = [1, 36], strides = [1, 1]} : vector<4x36xf32> to vector<1x36xf32>
    %168 = arith.subf %167, %163 : vector<1x36xf32>
    %169 = math.exp %168 : vector<1x36xf32>
    %170 = arith.addf %166, %169 : vector<1x36xf32>
    %171 = math.log %170 : vector<1x36xf32>
    %172 = arith.addf %163, %171 : vector<1x36xf32>
    %173 = vector.broadcast %172 : vector<1x36xf32> to vector<4x36xf32>
    %174 = arith.subf %160, %173 : vector<4x36xf32>
    %175 = math.absf %160 : vector<4x36xf32>
    %cst_52 = arith.constant 1.000000e+00 : f32
    %176 = vector.broadcast %cst_52 : f32 to vector<4x36xf32>
    %177 = arith.addf %176, %175 : vector<4x36xf32>
    %178 = arith.divf %160, %177 : vector<4x36xf32>
    %cst_53 = arith.constant 1.000000e+00 : f32
    %179 = vector.broadcast %cst_53 : f32 to vector<4x36xf32>
    %180 = arith.addf %179, %178 : vector<4x36xf32>
    %cst_54 = arith.constant 6.28318548 : f32
    %181 = vector.broadcast %cst_54 : f32 to vector<4x36xf32>
    %182 = arith.mulf %181, %180 : vector<4x36xf32>
    %183 = tpu.iota {dimensions = array<i32: 0>} : vector<4x36xi32>
    %c2_i32 = arith.constant 2 : i32
    %184 = vector.broadcast %c2_i32 : i32 to vector<4x36xi32>
    %185 = arith.cmpi slt, %183, %184 : vector<4x36xi32>
    %186 = arith.select %185, %174, %182 : vector<4x36xi1>, vector<4x36xf32>
    %c0_55 = arith.constant 0 : index
    %c0_56 = arith.constant 0 : index
    %187 = vector.load %arg13[%c0_55, %c0_56] : memref<4x36xf32, #tpu.memory_space<vmem>>, vector<4x36xf32>
    tpu.vector_store %arg13[%c0_55, %c0_56], %186 {strides = array<i32>} : memref<4x36xf32, #tpu.memory_space<vmem>>, vector<4x36xf32>,
    return
  }
  func.func @transform_0(%arg0: i32) -> (i32, i32) {
    %c0_i32 = arith.constant 0 : i32
    %c0_i32_0 = arith.constant 0 : i32
    return %c0_i32, %arg0 : i32, i32
  }
  func.func @transform_1(%arg0: i32) -> (i32, i32) {
    %c0_i32 = arith.constant 0 : i32
    %c0_i32_0 = arith.constant 0 : i32
    return %c0_i32, %arg0 : i32, i32
  }
  func.func @transform_2(%arg0: i32) -> (i32, i32) {
    %c0_i32 = arith.constant 0 : i32
    %c0_i32_0 = arith.constant 0 : i32
    %c0_i32_1 = arith.constant 0 : i32
    return %c0_i32, %c0_i32_0 : i32, i32
  }
  func.func @transform_3(%arg0: i32) -> (i32, i32) {
    %c0_i32 = arith.constant 0 : i32
    %c0_i32_0 = arith.constant 0 : i32
    %c0_i32_1 = arith.constant 0 : i32
    return %c0_i32, %c0_i32_0 : i32, i32
  }
  func.func @transform_4(%arg0: i32) -> (i32, i32) {
    %c0_i32 = arith.constant 0 : i32
    %c0_i32_0 = arith.constant 0 : i32
    %c0_i32_1 = arith.constant 0 : i32
    return %c0_i32, %c0_i32_0 : i32, i32
  }
  func.func @transform_5(%arg0: i32) -> (i32, i32) {
    %c0_i32 = arith.constant 0 : i32
    %c0_i32_0 = arith.constant 0 : i32
    %c0_i32_1 = arith.constant 0 : i32
    return %c0_i32, %c0_i32_0 : i32, i32
  }
  func.func @transform_6(%arg0: i32) -> (i32, i32) {
    %c0_i32 = arith.constant 0 : i32
    %c0_i32_0 = arith.constant 0 : i32
    %c0_i32_1 = arith.constant 0 : i32
    return %c0_i32, %c0_i32_0 : i32, i32
  }
  func.func @transform_7(%arg0: i32) -> (i32, i32) {
    %c0_i32 = arith.constant 0 : i32
    %c0_i32_0 = arith.constant 0 : i32
    %c0_i32_1 = arith.constant 0 : i32
    return %c0_i32, %c0_i32_0 : i32, i32
  }
  func.func @transform_8(%arg0: i32) -> (i32, i32) {
    %c0_i32 = arith.constant 0 : i32
    %c0_i32_0 = arith.constant 0 : i32
    %c0_i32_1 = arith.constant 0 : i32
    return %c0_i32, %c0_i32_0 : i32, i32
  }
  func.func @transform_9(%arg0: i32) -> (i32, i32) {
    %c0_i32 = arith.constant 0 : i32
    %c0_i32_0 = arith.constant 0 : i32
    %c0_i32_1 = arith.constant 0 : i32
    return %c0_i32, %c0_i32_0 : i32, i32
  }
  func.func @transform_10(%arg0: i32) -> (i32, i32) {
    %c0_i32 = arith.constant 0 : i32
    %c0_i32_0 = arith.constant 0 : i32
    %c0_i32_1 = arith.constant 0 : i32
    return %c0_i32, %c0_i32_0 : i32, i32
  }
  func.func @transform_11(%arg0: i32) -> (i32, i32) {
    %c0_i32 = arith.constant 0 : i32
    %c0_i32_0 = arith.constant 0 : i32
    %c0_i32_1 = arith.constant 0 : i32
    return %c0_i32, %c0_i32_0 : i32, i32
  }
  func.func @transform_12(%arg0: i32) -> (i32, i32) {
    %c0_i32 = arith.constant 0 : i32
    %c0_i32_0 = arith.constant 0 : i32
    return %c0_i32, %arg0 : i32, i32
  }
}

</mosaic_0001>

<bundles_post_ra>
// kernel: tpu_custom_call.1
= control target key start
LH: loop header
LB: loop body
LE: loop exit
PB: predicated region body
PF: predicated region fallthrough
CT: control target
= control target key end

     0   :  { %vm85_vm0 = vcmask 1045504   ;;  %vm72_vm1 = vcmask 48128   ;;  %v1281_v5 = vmov 1   ;;  %v1282_v8 = vmov 0   ;;  %s1907_s0 = inlined_call_operand.vmem [shape: f32[6,36], index: 0, kind: input, shape index: {}]   ;;  %s1908_s1 = inlined_call_operand.vmem [shape: f32[1,36], index: 1, kind: input, shape index: {}]   ;;  %s1909_s2 = inlined_call_operand.vmem [shape: f32[32,6], index: 2, kind: input, shape index: {}]   ;;  %s1910_s3 = inlined_call_operand.vmem [shape: f32[32,1], index: 3, kind: input, shape index: {}]   ;;  %s1911_s4 = inlined_call_operand.vmem [shape: f32[32,9], index: 4, kind: input, shape index: {}]   ;;  %s1912_s5 = inlined_call_operand.vmem [shape: f32[32,1], index: 5, kind: input, shape index: {}]   ;;  %s1913_s6 = inlined_call_operand.vmem [shape: f32[32,32], index: 6, kind: input, shape index: {}]   ;;  %s1914_s7 = inlined_call_operand.vmem [shape: f32[32,1], index: 7, kind: input, shape index: {}]   ;;  %s1915_s8 = inlined_call_operand.vmem [shape: f32[32,32], index: 8, kind: input, shape index: {}]   ;;  %s1916_s9 = inlined_call_operand.vmem [shape: f32[32,1], index: 9, kind: input, shape index: {}]   ;;  %s1917_s10 = inlined_call_operand.vmem [shape: f32[4,32], index: 10, kind: input, shape index: {}]   ;;  %s1918_s11 = inlined_call_operand.vmem [shape: f32[4,1], index: 11, kind: input, shape index: {}]   ;;  %s1919_s12 = inlined_call_operand.hbm [shape: f32[4,36], index: 12, kind: output, shape index: {}]  }
   0x1   :  { %v42_v0 = vld [vmem:[%s1907_s0] sm:$0x3f]  ;;  %v45_v2 = vld [vmem:[%s1909_s2 + $0x8] sm:$0xff]  ;;  %v46_v3 = vld [vmem:[%s1909_s2 + $0x10] sm:$0xff]  ;;  %1205 = vset.pattern.permute.xlu0 %v1281_v5  ;;  %1202 = vset.pattern.permute.xlu1 %v1282_v8 }
   0x2   :  { %v44_v1 = vld [vmem:[%s1909_s2] sm:$0xff]  ;;  %1135 = vmatprep.subr.msk.mxu0 %vm85_vm0, %v42_v0  ;;  %v1382_v4 = vld [vmem:[%s1911_s4 + $0x8] sm:$0xff]  ;;  %v47_v7 = vld [vmem:[%s1909_s2 + $0x18] sm:$0xff] }
   0x3   :  { %1137 = vmatprep.mubr.msk.f32.mxu0 %vm72_vm1, %v44_v1  ;;  %1136 = vmatpush3.msk.msra.mxu0 %vm85_vm0, %v42_v0  ;;  %v49_v6 = vld [vmem:[%s1910_s3 + $0x8] sm:$0xff]  ;;  %v51_v9 = vld [vmem:[%s1910_s3 + $0x18] sm:$0xff] }
   0x4   :  { %1138 = vmatmul.mubr.msk.f32.vlgmr.msra.gmra.mxu0 %vm72_vm1, %v45_v2  ;;  %249 = vperm.xlu0 %1205, %v1382_v4  }
   0x5   :  { %1140 = vmatprep.mubr.msk.f32.mxu0 %vm72_vm1, %v46_v3  ;;  %59 = vperm.xlu1 %1202, %v49_v6  }
   0x6   :  { %17 = vsyncpa [#allocation3], 0  ;;  %v48_v10 = vld [vmem:[%s1910_s3] sm:$0xff]  ;;  %v50_v11 = vld [vmem:[%s1910_s3 + $0x10] sm:$0xff]  ;;  %v1283_v23 = vmov 2   ;;  %v1284_v24 = vmov 3  }
   0x7   :  { %v1408_v12 = vld [vmem:[%s1911_s4 + $0x18] sm:$0xff]  ;;  %v1417_v15 = vld [vmem:[%s1911_s4 + $0x10] sm:$0xff]  ;;  %v179_v18 = vld [vmem:[%s1912_s5 + $0x8] sm:$0xff]  ;;  %v1285_v25 = vmov 4   ;;  %v1286_v26 = vmov 5   ;;  %v1287_v27 = vmov 6  }
   0x8   :  { %1141 = vmatmul.mubr.msk.f32.gmra.mxu0 %vm72_vm1, %v47_v7  ;;  %1206 = vset.pattern.permute.xlu0 %v1282_v8  ;;  %v181_v13 = vld [vmem:[%s1912_s5 + $0x18] sm:$0xff]  ;;  %v180_v16 = vld [vmem:[%s1912_s5 + $0x10] sm:$0xff]  ;;  %v1430_v19 = vld [vmem:[%s1911_s4] sm:$0xff]  ;;  %v183_v21 = vadd.f32 %v179_v18, %v1382_v4  ;;  %v1288_v28 = vmov 7   ;;  %v1289_v29 = vmov 8   ;;  %s1290_s4 = smov 7  }
   0x9   :  { %69 = vperm.xlu0 %1206, %v51_v9   ;;  %54 = vperm.xlu1 %1202, %v48_v10   ;;  %v185_v14 = vadd.f32 %v181_v13, %v1408_v12  ;;  %v184_v17 = vadd.f32 %v180_v16, %v1417_v15  ;;  %v178_v20 = vld [vmem:[%s1912_s5] sm:$0xff]  ;;  %s1291_s5 = smov 1   ;;  %s1292_s15 = smov 2   ;;  %v233_v9 = vlaneseq  ;;  %vm697_vm4 = vcmask 261120  }
   0xa   :  { %v182_v22 = vadd.f32 %v178_v20, %v1430_v19  ;;  %s1293_s16 = smov 5   ;;  %s1294_s17 = smov 3   ;;  %v669_v18 = vld [vmem:[%s1913_s6] sm:$0xff]  ;;  %vm226_vm6 = vcmask 7168   ;;  %vm282_vm9 = vcmask 15360   ;;  %vm334_vm11 = vcmask 23552  }
   0xb   :  { %s1295_s18 = smov 4   ;;  %s1296_s19 = smov 6   ;;  %1151 = vmatprep.mubr.msk.f32.mxu1 %vm697_vm4, %v669_v18  ;;  %vm386_vm13 = vcmask 31744  }
   0xc   :  { %s1297_s2 = smov 8  }
   0xd   :  { %64 = vperm.xlu0 %1206, %v50_v11   ;;  %1203 = vset.pattern.permute.xlu1 %v1281_v5  ;;  %v1603_v11 = vld [vmem:[%s1908_s1] sm:$0x1] }
   0xe   :  { %259 = vperm.xlu1 %1203, %v1408_v12   ;;  %vm231_vm2 = vcmp.ge.f32.partialorder %v1603_v11, 1.0  ;;  %vm287_vm3 = vcmp.ge.f32.partialorder %v1603_v11, 2.0  ;;  %vm339_vm5 = vcmp.ge.f32.partialorder %v1603_v11, 3.0  ;;  %vm391_vm8 = vcmp.ge.f32.partialorder %v1603_v11, 4.0 }
   0xf   :  { %v232_v16 = vsel %vm231_vm2, 1, %v1282_v8  ;;  %v392_v18 = vsel %vm391_vm8, 1, %v1282_v8  ;;  %vm443_vm15 = vcmp.ge.f32.partialorder %v1603_v11, 5.0  ;;  %vm494_vm0 = vcmp.ge.f32.partialorder %v1603_v11, 6.0 }
  0x10   :  { %vm546_vm2 = vcmp.ge.f32.partialorder %v1603_v11, 7.0  ;;  %vm541_vm8 = vcmask 56320  }
  0x11   :  { %203 = vperm.xlu0 %1206, %v185_v14  }
  0x12   :  { %254 = vperm.xlu1 %1203, %v1417_v15  }
  0x15   :  { %198 = vperm.xlu0 %1206, %v184_v17  }
  0x16   :  { %1204 = vset.pattern.permute.xlu1 %v1282_v8 }
  0x17   :  { %193 = vperm.xlu1 %1204, %v183_v21  }
  0x19   :  { %188 = vperm.xlu0 %1206, %v182_v22   ;;  %v288_v22 = vsel %vm287_vm3, 1, %v1282_v8  ;;  %vm438_vm3 = vcmask 39936  }
  0x1b   :  { %1207 = vset.pattern.permute.xlu1 %v1283_v23 }
  0x1c   :  { %307 = vperm.xlu1 %1207, %v1417_v15  }
  0x1d   :  { %1209 = vset.pattern.permute.xlu0 %v1283_v23 }
  0x1e   :  { %311 = vperm.xlu0 %1209, %v1408_v12  }
  0x20   :  { %1208 = vset.pattern.permute.xlu1 %v1284_v24 }
  0x21   :  { %363 = vperm.xlu1 %1208, %v1408_v12  }
  0x22   :  { %299 = vperm.xlu0 %1209, %v1430_v19  }
  0x25   :  { %1210 = vset.pattern.permute.xlu1 %v1281_v5 }
  0x26   :  { %1213 = vset.pattern.permute.xlu0 %v1284_v24  ;;  %244 = vperm.xlu1 %1210, %v1430_v19  }
  0x27   :  { %359 = vperm.xlu0 %1213, %v1417_v15  }
  0x2a   :  { %1211 = vset.pattern.permute.xlu1 %v1283_v23 }
  0x2b   :  { %351 = vperm.xlu0 %1213, %v1430_v19   ;;  %303 = vperm.xlu1 %1211, %v1382_v4  }
  0x2f   :  { %1217 = vset.pattern.permute.xlu0 %v1285_v25  ;;  %1212 = vset.pattern.permute.xlu1 %v1285_v25 }
  0x30   :  { %403 = vperm.xlu0 %1217, %v1430_v19   ;;  %415 = vperm.xlu1 %1212, %v1408_v12  }
  0x34   :  { %1218 = vset.pattern.permute.xlu0 %v1286_v26  ;;  %1214 = vset.pattern.permute.xlu1 %v1284_v24 }
  0x35   :  { %467 = vperm.xlu0 %1218, %v1408_v12   ;;  %355 = vperm.xlu1 %1214, %v1382_v4  }
  0x39   :  { %455 = vperm.xlu0 %1218, %v1430_v19   ;;  %1215 = vset.pattern.permute.xlu1 %v1285_v25  ;;  %v802_v25 = vld [vmem:[%s1916_s9 + $0x18] sm:$0xff] }
  0x3a   :  { %411 = vperm.xlu1 %1215, %v1417_v15  }
  0x3d   :  { %1220 = vset.pattern.permute.xlu0 %v1287_v27 }
  0x3e   :  { %518 = vperm.xlu0 %1220, %v1408_v12   ;;  %407 = vperm.xlu1 %1215, %v1382_v4  }
  0x42   :  { %506 = vperm.xlu0 %1220, %v1430_v19   ;;  %1216 = vset.pattern.permute.xlu1 %v1286_v26 }
  0x43   :  { %463 = vperm.xlu1 %1216, %v1417_v15  }
  0x46   :  { %1222 = vset.pattern.permute.xlu0 %v1288_v28 }
  0x47   :  { %570 = vperm.xlu0 %1222, %v1408_v12   ;;  %459 = vperm.xlu1 %1216, %v1382_v4  }
  0x4b   :  { %558 = vperm.xlu0 %1222, %v1430_v19   ;;  %1219 = vset.pattern.permute.xlu1 %v1287_v27 }
  0x4c   :  { %514 = vperm.xlu1 %1219, %v1417_v15  }
  0x4f   :  { %1224 = vset.pattern.permute.xlu0 %v1289_v29 }
  0x50   :  { %622 = vperm.xlu0 %1224, %v1408_v12   ;;  %510 = vperm.xlu1 %1219, %v1382_v4   ;;  %v1605_v12 = vshrl.u32 %v233_v9, 7 }
  0x54   :  { %1221 = vset.pattern.permute.xlu1 %v1288_v28  ;;  %v340_v28 = vsel %vm339_vm5, 1, %v1282_v8  ;;  %vm598_vm5 = vcmp.ge.f32.partialorder %v1603_v11, 8.0 }
  0x55   :  { %566 = vperm.xlu1 %1221, %v1417_v15  }
  0x59   :  { %562 = vperm.xlu1 %1221, %v1382_v4  }
  0x5d   :  { %1223 = vset.pattern.permute.xlu1 %v1289_v29  ;;  %v801_v29 = vld [vmem:[%s1916_s9 + $0x10] sm:$0xff] }
  0x5e   :  { %618 = vperm.xlu1 %1223, %v1417_v15   ;;  %v1613_v15 = vsub.s32 0, %v1605_v12 }
  0x60   :  { %v236_v20 = vrot.slane %v232_v16, %v1613_v15  ;;  %v292_v24 = vrot.slane %v288_v22, %v1613_v15 }
  0x62   :  { %614 = vperm.xlu1 %1223, %v1382_v4   ;;  %vm1632_vm7 = vcmp.eq.s32.totalorder %v236_v20, 1  ;;  %vm1659_vm10 = vcmp.eq.s32.totalorder %v292_v24, 1 }
  0x66   :  { %1225 = vset.pattern.permute.xlu1 %v1282_v8 }
  0x7f   :  { %v1468_v30 = vpop.permute.xlu0 %249 }
  0x80   :  { %v60_v31 = vpop.permute.xlu1 %59 }
  0x84   :  { %v70_v32 = vpop.permute.xlu0 %69  ;;  %v55_v34 = vpop.permute.xlu1 %54 }
  0x88   :  { %v65_v39 = vpop.permute.xlu0 %64 }
  0x89   :  { %v1478_v41 = vpop.permute.xlu1 %259 }
  0x8c   :  { %v1512_v46 = vpop.permute.xlu0 %203 }
  0x8d   :  { %v1490_v43 = vpop.permute.xlu1 %254 }
  0x90   :  { %v1520_v48 = vpop.permute.xlu0 %198 }
  0x92   :  { %v1496_v44 = vpop.permute.xlu1 %193 }
  0x94   :  { %v1531_v50 = vpop.permute.xlu0 %188 }
  0x97   :  { %v1506_v45 = vpop.permute.xlu1 %307 }
  0x99   :  { %v1541_v53 = vpop.permute.xlu0 %311 }
  0x9c   :  { %v1514_v47 = vpop.permute.xlu1 %363 }
  0x9d   :  { %v1549_v55 = vpop.permute.xlu0 %299 }
  0xa1   :  { %v1526_v49 = vpop.permute.xlu1 %244 }
  0xa2   :  { %v1555_v57 = vpop.permute.xlu0 %359 }
  0xa6   :  { %v1533_v51 = vpop.permute.xlu1 %303  ;;  %v1563_v59 = vpop.permute.xlu0 %351 }
  0xab   :  { %v1545_v54 = vpop.permute.xlu1 %415  ;;  %v1569_v61 = vpop.permute.xlu0 %403 }
  0xb0   :  { %v1551_v56 = vpop.permute.xlu1 %355  ;;  %v1576_v63 = vpop.permute.xlu0 %467 }
  0xb4   :  { %v1582_v1 = vpop.permute.xlu0 %455 }
  0xb5   :  { %v1559_v58 = vpop.permute.xlu1 %411 }
  0xb9   :  { %v1565_v60 = vpop.permute.xlu1 %407  ;;  %v1588_v3 = vpop.permute.xlu0 %518 }
  0xbd   :  { %v1592_v5 = vpop.permute.xlu0 %506 }
  0xbe   :  { %v1573_v62 = vpop.permute.xlu1 %463 }
  0xc2   :  { %v1578_v0 = vpop.permute.xlu1 %459  ;;  %v1596_v7 = vpop.permute.xlu0 %570 }
  0xc4   :  { %v1139_v33 = vpop.f32.mrf.mxu0 }
  0xc5   :  { %v1470_v35 = vadd.f32 %v1139_v33, %v60_v31 }
  0xc6   :  { %v155_v36 = vpop.f32.mrf.mxu0  ;;  %v1607_v13 = vpop.permute.xlu0 %558 }
  0xc7   :  { %531 = vrot.lane.b32.xlu0 %v1470_v35, %s1290_s4  ;;  %216 = vrot.lane.b32.xlu1 %v1470_v35, %s1291_s5  ;;  %v1476_v38 = vadd.f32 %v155_v36, %v55_v34  ;;  %v1585_v2 = vpop.permute.xlu1 %514  ;;  %v676_v34 = vld [vmem:[%s1914_s7 + $0x18] sm:$0xff]  ;;  %v207_v36 = vmul.f32 %v1496_v44, %v1470_v35  ;;  %v674_v44 = vld [vmem:[%s1914_s7 + $0x8] sm:$0xff] }
  0xc8   :  { %v1142_v37 = vpop.f32.mrf.mxu0 }
  0xc9   :  { %v1539_v52 = vadd.f32 %v1142_v37, %v70_v32  ;;  %v800_v32 = vld [vmem:[%s1916_s9 + $0x8] sm:$0xff] }
  0xca   :  { %v165_v40 = vpop.f32.mrf.mxu0 }
  0xcb   :  { %272 = vrot.lane.b32.xlu1 %v1470_v35, %s1292_s15  ;;  %426 = vrot.lane.b32.xlu0 %v1476_v38, %s1293_s16  ;;  %v1484_v42 = vadd.f32 %v165_v40, %v65_v39  ;;  %v1590_v4 = vpop.permute.xlu1 %510  ;;  %v1617_v17 = vpop.permute.xlu0 %622  ;;  %v344_v40 = vrot.slane %v340_v28, %v1613_v15 }
  0xcd   :  { %vm1677_vm12 = vcmp.eq.s32.totalorder %v344_v40, 1 }
  0xcf   :  { %324 = vrot.lane.b32.xlu1 %v1470_v35, %s1294_s17  ;;  %218 = vrot.lane.b32.xlu0 %v1484_v42, %s1291_s5 }
  0xd0   :  { %v1594_v6 = vpop.permute.xlu1 %566 }
  0xd3   :  { %376 = vrot.lane.b32.xlu1 %v1470_v35, %s1295_s18  ;;  %274 = vrot.lane.b32.xlu0 %v1484_v42, %s1292_s15 }
  0xd4   :  { %v1598_v10 = vpop.permute.xlu1 %562 }
  0xd7   :  { %428 = vrot.lane.b32.xlu1 %v1470_v35, %s1293_s16  ;;  %326 = vrot.lane.b32.xlu0 %v1484_v42, %s1294_s17 }
  0xd9   :  { %v1610_v14 = vpop.permute.xlu1 %618 }
  0xdb   :  { %480 = vrot.lane.b32.xlu1 %v1470_v35, %s1296_s19  ;;  %378 = vrot.lane.b32.xlu0 %v1484_v42, %s1295_s18 }
  0xdd   :  { %v1628_v21 = vpop.permute.xlu1 %614 }
  0xdf   :  { %430 = vrot.lane.b32.xlu0 %v1484_v42, %s1293_s16  ;;  %214 = vrot.lane.b32.xlu1 %v1476_v38, %s1291_s5 }
  0xe3   :  { %482 = vrot.lane.b32.xlu0 %v1484_v42, %s1296_s19  ;;  %270 = vrot.lane.b32.xlu1 %v1476_v38, %s1292_s15 }
  0xe7   :  { %533 = vrot.lane.b32.xlu0 %v1484_v42, %s1290_s4  ;;  %322 = vrot.lane.b32.xlu1 %v1476_v38, %s1294_s17 }
  0xeb   :  { %610 = vperm.xlu0 %1224, %v1430_v19   ;;  %374 = vrot.lane.b32.xlu1 %v1476_v38, %s1295_s18  ;;  %v795_v19 = vld [vmem:[%s1915_s8] sm:$0xff] }
  0xec   :  { %1165 = vmatprep.mubr.msk.f32.mxu0 %vm697_vm4, %v795_v19 }
  0xef   :  { %581 = vrot.lane.b32.xlu0 %v1476_v38, %s1297_s2  ;;  %478 = vrot.lane.b32.xlu1 %v1476_v38, %s1296_s19 }
  0xf0   :  { %1226 = vset.pattern.permute.xlu0 %v1282_v8 }
  0xf3   :  { %220 = vrot.lane.b32.xlu1 %v1539_v52, %s1291_s5  ;;  %815 = vperm.xlu0 %1226, %v801_v29  }
  0xf7   :  { %276 = vrot.lane.b32.xlu1 %v1539_v52, %s1292_s15  ;;  %694 = vperm.xlu0 %1226, %v676_v34  }
  0xfb   :  { %328 = vrot.lane.b32.xlu1 %v1539_v52, %s1294_s17  ;;  %684 = vperm.xlu0 %1226, %v674_v44   ;;  %v673_v44 = vld [vmem:[%s1914_s7] sm:$0xff] }
  0xff   :  { %380 = vrot.lane.b32.xlu1 %v1539_v52, %s1295_s18 }
 0x103   :  { %432 = vrot.lane.b32.xlu1 %v1539_v52, %s1293_s16 }
 0x107   :  { %484 = vrot.lane.b32.xlu1 %v1539_v52, %s1296_s19 }
 0x10b   :  { %535 = vrot.lane.b32.xlu1 %v1539_v52, %s1290_s4 }
 0x10f   :  { %587 = vrot.lane.b32.xlu1 %v1539_v52, %s1297_s2 }
 0x113   :  { %529 = vrot.lane.b32.xlu1 %v1476_v38, %s1290_s4 }
 0x117   :  { %585 = vrot.lane.b32.xlu1 %v1484_v42, %s1297_s2 }
 0x11b   :  { %583 = vrot.lane.b32.xlu1 %v1470_v35, %s1297_s2  ;;  %v799_v35 = vld [vmem:[%s1916_s9] sm:$0xff] }
 0x11f   :  { %820 = vperm.xlu1 %1225, %v802_v25   ;;  %v396_v25 = vrot.slane %v392_v18, %v1613_v15 }
 0x121   :  { %vm1695_vm14 = vcmp.eq.s32.totalorder %v396_v25, 1  ;;  %v208_v25 = vmul.f32 %v1520_v48, %v1484_v42 }
 0x123   :  { %810 = vperm.xlu1 %1225, %v800_v32  }
 0x127   :  { %805 = vperm.xlu1 %1225, %v799_v35  }
 0x139   :  { %v1640_v26 = vpop.permute.xlu0 %531  ;;  %v217_v27 = vpop.permute.xlu1 %216 }
 0x13a   :  { %v228_v31 = vsel %vm226_vm6, 0.0, %v217_v27 }
 0x13b   :  { %v239_v33 = vsel %vm1632_vm7, %v228_v31, 0.0 }
 0x13c   :  { %v263_v37 = vmul.f32 %v1468_v30, %v239_v33  ;;  %v675_v33 = vld [vmem:[%s1914_s7 + $0x10] sm:$0xff] }
 0x13d   :  { %v273_v9 = vpop.permute.xlu1 %272  ;;  %v1664_v16 = vpop.permute.xlu0 %426  ;;  %689 = vperm.xlu1 %1225, %v675_v33  }
 0x13e   :  { %v267_v19 = vadd.f32 %v263_v37, %v207_v36  ;;  %v284_v20 = vsel %vm282_vm9, 0.0, %v273_v9  ;;  %v965_v36 = vld [vmem:[%s1918_s11] sm:$0xf] }
 0x13f   :  { %v295_v30 = vsel %vm1659_vm10, %v284_v20, 0.0  ;;  %968 = vperm.xlu0 %1226, %v965_v36  }
 0x140   :  { %v315_v22 = vmul.f32 %v1533_v51, %v295_v30 }
 0x141   :  { %v325_v27 = vpop.permute.xlu1 %324  ;;  %v219_v28 = vpop.permute.xlu0 %218  ;;  %679 = vperm.xlu1 %1225, %v673_v44  }
 0x142   :  { %v319_v29 = vadd.f32 %v315_v22, %v267_v19  ;;  %v336_v31 = vsel %vm334_vm11, 0.0, %v325_v27  ;;  %v229_v32 = vsel %vm226_vm6, 0.0, %v219_v28 }
 0x143   :  { %v347_v51 = vsel %vm1677_vm12, %v336_v31, 0.0  ;;  %v240_v34 = vsel %vm1632_vm7, %v229_v32, 0.0 }
 0x144   :  { %v367_v37 = vmul.f32 %v1551_v56, %v347_v51  ;;  %v264_v20 = vmul.f32 %v1490_v43, %v240_v34 }
 0x145   :  { %v377_v9 = vpop.permute.xlu1 %376  ;;  %v275_v18 = vpop.permute.xlu0 %274 }
 0x146   :  { %v371_v19 = vadd.f32 %v367_v37, %v319_v29  ;;  %v388_v35 = vsel %vm386_vm13, 0.0, %v377_v9  ;;  %v285_v30 = vsel %vm282_vm9, 0.0, %v275_v18  ;;  %v268_v31 = vadd.f32 %v264_v20, %v208_v25 }
 0x147   :  { %v399_v56 = vsel %vm1695_vm14, %v388_v35, 0.0  ;;  %v296_v22 = vsel %vm1659_vm10, %v285_v30, 0.0 }
 0x148   :  { %v419_v43 = vmul.f32 %v1565_v60, %v399_v56  ;;  %v316_v27 = vmul.f32 %v1506_v45, %v296_v22 }
 0x149   :  { %v1713_v28 = vpop.permute.xlu1 %428  ;;  %v327_v29 = vpop.permute.xlu0 %326 }
 0x14a   :  { %v1715_v32 = vadd.f32 %v419_v43, %v371_v19  ;;  %v337_v33 = vsel %vm334_vm11, 0.0, %v327_v29  ;;  %v320_v34 = vadd.f32 %v316_v27, %v268_v31 }
 0x14b   :  { %v348_v51 = vsel %vm1677_vm12, %v337_v33, 0.0 }
 0x14c   :  { %v368_v36 = vmul.f32 %v1555_v57, %v348_v51  ;;  %v206_v57 = vmul.f32 %v1531_v50, %v1476_v38 }
 0x14d   :  { %v1721_v42 = vpop.permute.xlu1 %480  ;;  %v379_v33 = vpop.permute.xlu0 %378 }
 0x14e   :  { %v1723_v48 = vadd.f32 %v368_v36, %v320_v34 }
 0x151   :  { %v215_v45 = vpop.permute.xlu1 %214 }
 0x152   :  { %v227_v60 = vsel %vm226_vm6, 0.0, %v215_v45 }
 0x153   :  { %v238_v37 = vsel %vm1632_vm7, %v227_v60, 0.0  ;;  %v209_v60 = vmul.f32 %v1512_v46, %v1539_v52 }
 0x154   :  { %v262_v20 = vmul.f32 %v1526_v49, %v238_v37 }
 0x155   :  { %v271_v9 = vpop.permute.xlu1 %270 }
 0x156   :  { %v283_v18 = vsel %vm282_vm9, 0.0, %v271_v9  ;;  %v266_v22 = vadd.f32 %v262_v20, %v206_v57  ;;  %v431_v9 = vpop.permute.xlu0 %430  ;;  %v547_v57 = vsel %vm546_vm2, 1, %v1282_v8 }
 0x157   :  { %v294_v19 = vsel %vm1659_vm10, %v283_v18, 0.0 }
 0x158   :  { %v314_v30 = vmul.f32 %v1549_v55, %v294_v19 }
 0x159   :  { %v323_v35 = vpop.permute.xlu1 %322 }
 0x15a   :  { %v335_v44 = vsel %vm334_vm11, 0.0, %v323_v35  ;;  %v318_v27 = vadd.f32 %v314_v30, %v266_v22  ;;  %v483_v46 = vpop.permute.xlu0 %482  ;;  %v495_v35 = vsel %vm494_vm0, 1, %v1282_v8  ;;  %vm1079_vm0 = vcmask 289792  }
 0x15b   :  { %v346_v56 = vsel %vm1677_vm12, %v335_v44, 0.0  ;;  %v499_v44 = vrot.slane %v495_v35, %v1613_v15 }
 0x15c   :  { %v366_v25 = vmul.f32 %v1563_v59, %v346_v56 }
 0x15d   :  { %v375_v43 = vpop.permute.xlu1 %374 }
 0x15e   :  { %v387_v29 = vsel %vm386_vm13, 0.0, %v375_v43  ;;  %v370_v31 = vadd.f32 %v366_v25, %v318_v27  ;;  %v534_v43 = vpop.permute.xlu0 %533 }
 0x15f   :  { %v398_v49 = vsel %vm1695_vm14, %v387_v29, 0.0  ;;  %v551_v29 = vrot.slane %v547_v57, %v1613_v15 }
 0x160   :  { %v418_v38 = vmul.f32 %v1569_v61, %v398_v49 }
 0x161   :  { %v479_v50 = vpop.permute.xlu1 %478 }
 0x162   :  { %v1743_v55 = vadd.f32 %v418_v38, %v370_v31  ;;  %v599_v31 = vsel %vm598_vm5, 1, %v1282_v8 }
 0x165   :  { %v221_v51 = vpop.permute.xlu1 %220 }
 0x166   :  { %v230_v34 = vsel %vm226_vm6, 0.0, %v221_v51 }
 0x167   :  { %v241_v59 = vsel %vm1632_vm7, %v230_v34, 0.0  ;;  %vm1778_vm7 = vcmp.eq.s32.totalorder %v499_v44, 1  ;;  %v439_v34 = vsel %vm438_vm3, 0.0, %v1664_v16 }
 0x168   :  { %v265_v36 = vmul.f32 %v1478_v41, %v241_v59  ;;  %v444_v41 = vsel %vm443_vm15, 1, %v1282_v8  ;;  %v389_v59 = vsel %vm386_vm13, 0.0, %v379_v33  ;;  %v611_v8 = vpop.permute.xlu0 %610 }
 0x169   :  { %v277_v45 = vpop.permute.xlu1 %276 }
 0x16a   :  { %v286_v37 = vsel %vm282_vm9, 0.0, %v277_v45  ;;  %v269_v18 = vadd.f32 %v265_v36, %v209_v60  ;;  %vm1792_vm9 = vcmp.eq.s32.totalorder %v551_v29, 1 }
 0x16b   :  { %v297_v61 = vsel %vm1659_vm10, %v286_v37, 0.0  ;;  %vm593_vm10 = vcmask 64512  }
 0x16c   :  { %v317_v19 = vmul.f32 %v1541_v53, %v297_v61  ;;  %v448_v53 = vrot.slane %v444_v41, %v1613_v15  ;;  %v490_v41 = vsel %vm72_vm1, 0.0, %v479_v50  ;;  %v582_v44 = vpop.permute.xlu0 %581 }
 0x16d   :  { %v329_v20 = vpop.permute.xlu1 %328 }
 0x16e   :  { %v321_v23 = vadd.f32 %v317_v19, %v269_v18  ;;  %v338_v39 = vsel %vm334_vm11, 0.0, %v329_v20  ;;  %vm1772_vm6 = vcmp.eq.s32.totalorder %v448_v53, 1  ;;  %v400_v18 = vsel %vm1695_vm14, %v389_v59, 0.0 }
 0x16f   :  { %v349_v56 = vsel %vm1677_vm12, %v338_v39, 0.0  ;;  %v450_v33 = vsel %vm1772_vm6, %v439_v34, 0.0  ;;  %v441_v19 = vsel %vm438_vm3, 0.0, %v431_v9  ;;  %v420_v53 = vmul.f32 %v1559_v58, %v400_v18 }
 0x170   :  { %v369_v11 = vmul.f32 %v1514_v47, %v349_v56  ;;  %v603_v47 = vrot.slane %v599_v31, %v1613_v15  ;;  %v452_v50 = vsel %vm1772_vm6, %v441_v19, 0.0  ;;  %v470_v57 = vmul.f32 %v1582_v1, %v450_v33 }
 0x171   :  { %v381_v52 = vpop.permute.xlu1 %380  ;;  %v594_v31 = vsel %vm593_vm10, 0.0, %v582_v44  ;;  %v543_v34 = vsel %vm541_vm8, 0.0, %v1640_v26 }
 0x172   :  { %v390_v30 = vsel %vm386_vm13, 0.0, %v381_v52  ;;  %v373_v61 = vadd.f32 %v369_v11, %v321_v23  ;;  %vm1808_vm11 = vcmp.eq.s32.totalorder %v603_v47, 1  ;;  %v474_v58 = vadd.f32 %v470_v57, %v1743_v55 }
 0x173   :  { %v401_v27 = vsel %vm1695_vm14, %v390_v30, 0.0  ;;  %v501_v30 = vsel %vm1778_vm7, %v490_v41, 0.0  ;;  %v554_v26 = vsel %vm1792_vm9, %v543_v34, 0.0 }
 0x174   :  { %v421_v36 = vmul.f32 %v1545_v54, %v401_v27  ;;  %v440_v54 = vsel %vm438_vm3, 0.0, %v1713_v28  ;;  %v491_v28 = vsel %vm72_vm1, 0.0, %v1721_v42  ;;  %v472_v27 = vmul.f32 %v1573_v62, %v452_v50 }
 0x175   :  { %v433_v22 = vpop.permute.xlu1 %432  ;;  %v502_v1 = vsel %vm1778_vm7, %v491_v28, 0.0  ;;  %v521_v49 = vmul.f32 %v1592_v5, %v501_v30  ;;  %v574_v37 = vmul.f32 %v1598_v10, %v554_v26 }
 0x176   :  { %v442_v25 = vsel %vm438_vm3, 0.0, %v433_v22  ;;  %v425_v52 = vadd.f32 %v421_v36, %v373_v61  ;;  %v544_v22 = vsel %vm541_vm8, 0.0, %v534_v43  ;;  %v522_v36 = vmul.f32 %v1590_v4, %v502_v1 }
 0x177   :  { %v453_v38 = vsel %vm1772_vm6, %v442_v25, 0.0  ;;  %v555_v62 = vsel %vm1792_vm9, %v544_v22, 0.0 }
 0x178   :  { %v473_v16 = vmul.f32 %v1576_v63, %v453_v38  ;;  %v492_v63 = vsel %vm72_vm1, 0.0, %v483_v46  ;;  %v451_v46 = vsel %vm1772_vm6, %v440_v54, 0.0 }
 0x179   :  { %v485_v51 = vpop.permute.xlu1 %484  ;;  %v503_v42 = vsel %vm1778_vm7, %v492_v63, 0.0  ;;  %v471_v38 = vmul.f32 %v1578_v0, %v451_v46  ;;  %v605_v0 = vsel %vm1808_vm11, %v594_v31, 0.0 }
 0x17a   :  { %v493_v45 = vsel %vm72_vm1, 0.0, %v485_v51  ;;  %v477_v9 = vadd.f32 %v473_v16, %v425_v52  ;;  %v424_v51 = vadd.f32 %v420_v53, %v1723_v48  ;;  %v523_v24 = vmul.f32 %v1585_v2, %v503_v42 }
 0x17b   :  { %v504_v60 = vsel %vm1778_vm7, %v493_v45, 0.0  ;;  %v575_v2 = vmul.f32 %v1594_v6, %v555_v62  ;;  %v525_v48 = vadd.f32 %v521_v49, %v474_v58  ;;  %v475_v61 = vadd.f32 %v471_v38, %v1715_v32 }
 0x17c   :  { %v524_v35 = vmul.f32 %v1588_v3, %v504_v60  ;;  %v476_v45 = vadd.f32 %v472_v27, %v424_v51  ;;  %v625_v33 = vmul.f32 %v611_v8, %v605_v0  ;;  %v796_v0 = vld [vmem:[%s1915_s8 + $0x8] sm:$0xff]  ;;  %vm1299_vm1 = vmmov 0  }
 0x17d   :  { %v536_v20 = vpop.permute.xlu1 %535 }
 0x17e   :  { %v545_v23 = vsel %vm541_vm8, 0.0, %v536_v20  ;;  %v528_v25 = vadd.f32 %v524_v35, %v477_v9  ;;  %v527_v16 = vadd.f32 %v523_v24, %v476_v45  ;;  %v526_v20 = vadd.f32 %v522_v36, %v475_v61  ;;  %v670_v45 = vld [vmem:[%s1913_s6 + $0x8] sm:$0xff] }
 0x17f   :  { %v556_v40 = vsel %vm1792_vm9, %v545_v23, 0.0 }
 0x180   :  { %v576_v3 = vmul.f32 %v1596_v7, %v556_v40  ;;  %v579_v41 = vadd.f32 %v575_v2, %v527_v16  ;;  %v578_v9 = vadd.f32 %v574_v37, %v526_v20  ;;  %v797_v2 = vld [vmem:[%s1915_s8 + $0x10] sm:$0xff] }
 0x181   :  { %v588_v56 = vpop.permute.xlu1 %587 }
 0x182   :  { %v597_v7 = vsel %vm593_vm10, 0.0, %v588_v56  ;;  %v580_v11 = vadd.f32 %v576_v3, %v528_v25 }
 0x183   :  { %v608_v29 = vsel %vm1808_vm11, %v597_v7, 0.0 }
 0x184   :  { %v628_v43 = vmul.f32 %v1617_v17, %v608_v29 }
 0x185   :  { %v530_v55 = vpop.permute.xlu1 %529 }
 0x186   :  { %v632_v59 = vadd.f32 %v628_v43, %v580_v11  ;;  %v542_v5 = vsel %vm541_vm8, 0.0, %v530_v55 }
 0x187   :  { %v553_v17 = vsel %vm1792_vm9, %v542_v5, 0.0 }
 0x188   :  { %v640_v47 = vmul.f32 0.044715, %v632_v59  ;;  %v573_v60 = vmul.f32 %v1607_v13, %v553_v17  ;;  %v636_v58 = vmul.f32 0.5, %v632_v59  ;;  %v671_v17 = vld [vmem:[%s1913_s6 + $0x10] sm:$0xff] }
 0x189   :  { %v586_v4 = vpop.permute.xlu1 %585 }
 0x18a   :  { %v644_v54 = vmul.f32 %v640_v47, %v632_v59  ;;  %v577_v18 = vadd.f32 %v573_v60, %v525_v48  ;;  %v596_v19 = vsel %vm593_vm10, 0.0, %v586_v4  ;;  %v672_v48 = vld [vmem:[%s1913_s6 + $0x18] sm:$0xff]  ;;  %v1298_v60 = vmov 0.0  }
 0x18b   :  { %v607_v6 = vsel %vm1808_vm11, %v596_v19, 0.0  ;;  %v798_v47 = vld [vmem:[%s1915_s8 + $0x18] sm:$0xff] }
 0x18c   :  { %v629_v52 = vadd.f32 %v625_v33, %v577_v18  ;;  %v627_v13 = vmul.f32 %v1610_v14, %v607_v6  ;;  %v648_v35 = vmul.f32 %v644_v54, %v632_v59 }
 0x18d   :  { %v584_v23 = vpop.permute.xlu1 %583 }
 0x18e   :  { %v637_v32 = vmul.f32 0.044715, %v629_v52  ;;  %v631_v63 = vadd.f32 %v627_v13, %v579_v41  ;;  %v595_v8 = vsel %vm593_vm10, 0.0, %v584_v23  ;;  %v652_v40 = vadd.f32 %v648_v35, %v632_v59 }
 0x18f   :  { %v606_v28 = vsel %vm1808_vm11, %v595_v8, 0.0  ;;  %v633_v5 = vmul.f32 0.5, %v629_v52 }
 0x190   :  { %v639_v50 = vmul.f32 0.044715, %v631_v63  ;;  %v626_v3 = vmul.f32 %v1628_v21, %v606_v28  ;;  %v656_v57 = vmul.f32 0.7978846, %v652_v40  ;;  %v641_v46 = vmul.f32 %v637_v32, %v629_v52 }
 0x191   :  { %v635_v11 = vmul.f32 0.5, %v631_v63 }
 0x192   :  { %v643_v53 = vmul.f32 %v639_v50, %v631_v63  ;;  %v630_v14 = vadd.f32 %v626_v3, %v578_v9  ;;  %1227 = vtanh.f32 %v656_v57  ;;  %v645_v30 = vmul.f32 %v641_v46, %v629_v52 }
 0x194   :  { %v638_v10 = vmul.f32 0.044715, %v630_v14  ;;  %v647_v44 = vmul.f32 %v643_v53, %v631_v63  ;;  %v649_v56 = vadd.f32 %v645_v30, %v629_v52  ;;  %v634_v62 = vmul.f32 0.5, %v630_v14  ;;  %v816_v52 = vpop.permute.xlu0 %815 }
 0x196   :  { %v642_v42 = vmul.f32 %v638_v10, %v630_v14  ;;  %v651_v22 = vadd.f32 %v647_v44, %v631_v63  ;;  %v653_v1 = vmul.f32 0.7978846, %v649_v56 }
 0x198   :  { %v655_v25 = vmul.f32 0.7978846, %v651_v22  ;;  %v646_v7 = vmul.f32 %v642_v42, %v630_v14 }
 0x19a   :  { %1229 = vtanh.f32 %v655_v25  ;;  %v650_v39 = vadd.f32 %v646_v7, %v630_v14  ;;  %v821_v26 = vpop.permute.xlu1 %820 }
 0x19b   :  { %1231 = vtanh.f32 %v653_v1 }
 0x19c   :  { %v654_v27 = vmul.f32 0.7978846, %v650_v39  ;;  %v695_v39 = vpop.permute.xlu0 %694 }
 0x19e   :  { %1233 = vtanh.f32 %v654_v27  ;;  %v811_v61 = vpop.permute.xlu1 %810 }
 0x19f   :  { %v1228_v21 = vpop.eup %1227 }
 0x1a0   :  { %v664_v29 = vadd.f32 1.0, %v1228_v21 }
 0x1a2   :  { %v668_v49 = vmul.f32 %v664_v29, %v636_v58  ;;  %v806_v33 = vpop.permute.xlu1 %805 }
 0x1a4   :  { %1143 = vmatprep.subr.mxu1 %v668_v49  ;;  %1157 = vmatprep.subr.mxu0 %v668_v49 }
 0x1a5   :  { %1144 = vmatpush3.msra.mxu1 %v668_v49  ;;  %1158 = vmatpush3.msra.mxu0 %v668_v49 }
 0x1a7   :  { %v1230_v31 = vpop.eup %1229 }
 0x1a8   :  { %v663_v43 = vadd.f32 1.0, %v1230_v31  ;;  %v1232_v38 = vpop.eup %1231 }
 0x1a9   :  { %v661_v34 = vadd.f32 1.0, %v1232_v38 }
 0x1aa   :  { %v667_v51 = vmul.f32 %v663_v43, %v635_v11 }
 0x1ab   :  { %v1234_v24 = vpop.eup %1233  ;;  %v665_v36 = vmul.f32 %v661_v34, %v633_v5  ;;  %v685_v34 = vpop.permute.xlu0 %684 }
 0x1ac   :  { %1145 = vmatprep.subr.mxu1 %v667_v51  ;;  %1159 = vmatprep.subr.mxu0 %v667_v51  ;;  %v662_v55 = vadd.f32 1.0, %v1234_v24 }
 0x1ad   :  { %1146 = vmatpush3.msra.mxu1 %v667_v51  ;;  %1160 = vmatpush3.msra.mxu0 %v667_v51 }
 0x1ae   :  { %v666_v59 = vmul.f32 %v662_v55, %v634_v62 }
 0x1b0   :  { %1147 = vmatprep.subr.mxu1 %v666_v59  ;;  %1161 = vmatprep.subr.mxu0 %v666_v59 }
 0x1b1   :  { %1148 = vmatpush3.msra.mxu1 %v666_v59  ;;  %1162 = vmatpush3.msra.mxu0 %v666_v59 }
 0x1b2   :  { %1149 = vmatprep.subr.mxu1 %v665_v36  ;;  %1163 = vmatprep.subr.mxu0 %v665_v36 }
 0x1b3   :  { %1150 = vmatpush3.msra.mxu1 %v665_v36  ;;  %1164 = vmatpush3.msra.mxu0 %v665_v36 }
 0x1b4   :  { %1152 = vmatmul.mubr.msk.f32.vlgmr.msra.gmra.mxu1 %vm697_vm4, %v670_v45  ;;  %1166 = vmatmul.mubr.msk.f32.vlgmr.msra.gmra.mxu0 %vm697_vm4, %v796_v0 }
 0x1b5   :  { %1154 = vmatprep.mubr.msk.f32.mxu1 %vm697_vm4, %v671_v17  ;;  %1168 = vmatprep.mubr.msk.f32.mxu0 %vm697_vm4, %v797_v2 }
 0x1b6   :  { %1171 = vmatprep.subr.mxu1 %v1298_v60 }
 0x1b8   :  { %1155 = vmatmul.mubr.msk.f32.gmra.mxu1 %vm697_vm4, %v672_v48  ;;  %1169 = vmatmul.mubr.msk.f32.gmra.mxu0 %vm697_vm4, %v798_v47  ;;  %v690_v27 = vpop.permute.xlu1 %689  ;;  %v964_v47 = vld [vmem:[%s1917_s10] sm:$0xf]  ;;  %s1300_s10 = smov [#allocation2]  }
 0x1b9   :  { %1179 = vmatprep.mubr.msk.f32.mxu1 %vm1299_vm1, %v1298_v60  ;;  %s1087_s3 = sshll.u32 %s1300_s10, 4  ;;  %s1088_s3 = int_to_ptr.vmem [resolvable:$true] %s1087_s3 }
 0x1ba   :  { %s1259_s28 = scalar_lea.vmem %s1088_s3, 64  ;;  %p1264_p1 = scmp.lt.s32.totalorder %s1088_s3, %s1088_s3 }
 0x1bb   :  { %p1260_p0 = scmp.ne.s32.totalorder %s1088_s3, %s1259_s28  ;;  %p1265_p2 = scmp.lt.s32.totalorder %s1259_s28, %s1259_s28 }
 0x1bc   :  { %v680_v5 = vpop.permute.xlu1 %679 }
 0x1bd   :  { %p1266_p3 = por %p1265_p2, %p1264_p1 }
 0x1bf   :  { %p1267_p4 = pnand %p1266_p3, %p1260_p0 }
 0x274   :  { %v1167_v16 = vpop.f32.mrf.mxu0  ;;  %v1153_v42 = vpop.f32.mrf.mxu1 }
 0x275   :  { %v907_v4 = vadd.f32 %v1167_v16, %v811_v61  ;;  %v782_v45 = vadd.f32 %v1153_v42, %v685_v34 }
 0x276   :  { %v901_v54 = vpop.f32.mrf.mxu0  ;;  %v776_v22 = vpop.f32.mrf.mxu1 }
 0x277   :  { %v921_v18 = vand.u32 2147483647, %v907_v4  ;;  %v1891_v19 = vadd.f32 %v901_v54, %v806_v33  ;;  %vm937_vm14 = vcmp.ge.f32.partialorder %v907_v4, 0.0  ;;  %v777_v2 = vadd.f32 %v776_v22, %v680_v5 }
 0x278   :  { %v1170_v20 = vpop.f32.mrf.mxu0  ;;  %v1156_v25 = vpop.f32.mrf.mxu1 }
 0x279   :  { %v925_v6 = vsub.f32 0.0, %v921_v18  ;;  %v920_v41 = vand.u32 2147483647, %v1891_v19  ;;  %v917_v13 = vadd.f32 %v1170_v20, %v821_v26  ;;  %v792_v11 = vadd.f32 %v1156_v25, %v695_v39  ;;  %v969_v26 = vpop.permute.xlu0 %968 }
 0x27a   :  { %v911_v35 = vpop.f32.mrf.mxu0  ;;  %v786_v58 = vpop.f32.mrf.mxu1  ;;  %vm936_vm15 = vcmp.ge.f32.partialorder %v1891_v19, 0.0 }
 0x27b   :  { %v930_v37 = vmul.f32 1.442695, %v925_v6  ;;  %v924_v23 = vsub.f32 0.0, %v920_v41  ;;  %v912_v32 = vadd.f32 %v911_v35, %v816_v52  ;;  %v923_v63 = vand.u32 2147483647, %v917_v13 }
 0x27c   :  { %vm939_vm12 = vcmp.ge.f32.partialorder %v917_v13, 0.0  ;;  %v787_v24 = vadd.f32 %v786_v58, %v690_v27 }
 0x27d   :  { %1235 = vpow2.f32 %v930_v37  ;;  %v928_v8 = vmul.f32 1.442695, %v924_v23  ;;  %v922_v40 = vand.u32 2147483647, %v912_v32  ;;  %v927_v28 = vsub.f32 0.0, %v923_v63 }
 0x27e   :  { %vm938_vm13 = vcmp.ge.f32.partialorder %v912_v32, 0.0 }
 0x27f   :  { %1237 = vpow2.f32 %v928_v8  ;;  %v926_v50 = vsub.f32 0.0, %v922_v40  ;;  %v934_v9 = vmul.f32 1.442695, %v927_v28 }
 0x281   :  { %v932_v3 = vmul.f32 1.442695, %v926_v50  ;;  %1239 = vpow2.f32 %v934_v9 }
 0x283   :  { %1241 = vpow2.f32 %v932_v3 }
 0x28a   :  { %v1236_v57 = vpop.eup %1235 }
 0x28b   :  { %v941_v53 = vadd.f32 1.0, %v1236_v57 }
 0x28c   :  { %v1238_v46 = vpop.eup %1237 }
 0x28d   :  { %v940_v14 = vadd.f32 1.0, %v1238_v46  ;;  %1243 = vrcp.f32 %v941_v53 }
 0x28e   :  { %v1240_v30 = vpop.eup %1239 }
 0x28f   :  { %v943_v44 = vadd.f32 1.0, %v1240_v30  ;;  %1245 = vrcp.f32 %v940_v14 }
 0x290   :  { %v1242_v10 = vpop.eup %1241 }
 0x291   :  { %v942_v56 = vadd.f32 1.0, %v1242_v10  ;;  %1247 = vrcp.f32 %v943_v44 }
 0x293   :  { %1249 = vrcp.f32 %v942_v56 }
 0x29a   :  { %v1244_v7 = vpop.eup %1243 }
 0x29b   :  { %v953_v49 = vmul.f32 %v1244_v7, %v1236_v57 }
 0x29c   :  { %v1246_v1 = vpop.eup %1245 }
 0x29d   :  { %v952_v38 = vmul.f32 %v1246_v1, %v1238_v46  ;;  %v957_v59 = vsel %vm937_vm14, %v1244_v7, %v953_v49 }
 0x29e   :  { %v1248_v21 = vpop.eup %1247  ;;  %v961_v17 = vmul.f32 %v957_v59, %v782_v45 }
 0x29f   :  { %v955_v31 = vmul.f32 %v1248_v21, %v1240_v30  ;;  %v956_v0 = vsel %vm936_vm15, %v1246_v1, %v952_v38 }
 0x2a0   :  { %v1250_v29 = vpop.eup %1249  ;;  %v960_v48 = vmul.f32 %v956_v0, %v777_v2 }
 0x2a1   :  { %v954_v43 = vmul.f32 %v1250_v29, %v1242_v10  ;;  %v959_v51 = vsel %vm939_vm12, %v1248_v21, %v955_v31 }
 0x2a2   :  { %v963_v62 = vmul.f32 %v959_v51, %v792_v11 }
 0x2a3   :  { %v958_v55 = vsel %vm938_vm13, %v1250_v29, %v954_v43 }
 0x2a4   :  { %v962_v36 = vmul.f32 %v958_v55, %v787_v24  ;;  %1172 = vmatpush3.msra.mxu1 %v963_v62 }
 0x2a5   :  { %1173 = vmatprep.subr.mxu1 %v1298_v60 }
 0x2a6   :  { %1174 = vmatpush3.msra.mxu1 %v962_v36 }
 0x2a7   :  { %1175 = vmatprep.subr.mxu1 %v1298_v60 }
 0x2a8   :  { %1176 = vmatpush3.msra.mxu1 %v961_v17 }
 0x2a9   :  { %1177 = vmatprep.subr.mxu1 %v1298_v60 }
 0x2aa   :  { %1178 = vmatpush3.msra.mxu1 %v960_v48 }
 0x2ab   :  { %1180 = vmatmul.mubr.msk.f32.vlgmr.msra.gmra.mxu1 %vm697_vm4, %v964_v47  ;;  %vm1077_vm4 = vcmp.lt.s32.totalorder %v1605_v12, 2 }
 0x36b   :  { %v1040_v61 = vpop.f32.mrf.mxu1 }
 0x36c   :  { %v1041_v16 = vadd.f32 %v1040_v61, %v969_v26 }
 0x36d   :  { %v1181_v4 = vpop.f32.mrf.mxu1 }
 0x36e   :  { %v1045_v33 = vrot.slane %v1041_v16, 1  ;;  %v1069_v52 = vand.u32 2147483647, %v1041_v16 }
 0x370   :  { %v1047_v54 = vmax.f32 %v1041_v16, %v1045_v33  ;;  %v1070_v13 = vadd.f32 1.0, %v1069_v52 }
 0x372   :  { %v1048_v18 = vsub.f32 %v1041_v16, %v1047_v54  ;;  %v1052_v19 = vrot.slane %v1047_v54, 7 }
 0x374   :  { %v1054_v20 = vsub.f32 %v1041_v16, %v1052_v19  ;;  %v1049_v6 = vmul.f32 1.442695, %v1048_v18 }
 0x376   :  { %v1055_v41 = vmul.f32 1.442695, %v1054_v20 }
 0x378   :  { %1251 = vpow2.f32 %v1055_v41 }
 0x379   :  { %1253 = vpow2.f32 %v1049_v6 }
 0x37a   :  { %1255 = vrcp.f32 %v1070_v13 }
 0x385   :  { %v1252_v35 = vpop.eup %1251 }
 0x386   :  { %v1058_v60 = vrot.slane %v1252_v35, 1  ;;  %v1254_v37 = vpop.eup %1253 }
 0x387   :  { %v1256_v32 = vpop.eup %1255 }
 0x388   :  { %v1060_v23 = vadd.f32 %v1254_v37, %v1058_v60  ;;  %v1072_v63 = vmul.f32 %v1256_v32, %v1041_v16 }
 0x38a   :  { %1257 = vlog2.f32 %v1060_v23  ;;  %v1073_v50 = vadd.f32 1.0, %v1072_v63 }
 0x38c   :  { %v1074_v57 = vmul.f32 6.2831855, %v1073_v50 }
 0x397   :  { %v1258_v8 = vpop.eup %1257 }
 0x398   :  { %v1062_v40 = vmul.f32 0.6931472, %v1258_v8 }
 0x39a   :  { %v1063_v28 = vadd.f32 %v1062_v40, %v1047_v54 }
 0x39c   :  { %v1067_v9 = vrot.slane %v1063_v28, %v1613_v15 }
 0x39e   :  { %v1068_v3 = vsub.f32 %v1041_v16, %v1067_v9 }
 0x3a0   :  { %v1078_v46 = vsel %vm1077_vm4, %v1068_v3, %v1074_v57 }
 0x3a1   :  { %1080 = vst.msk [vmem:[#allocation2] sm:$0xf] %vm1079_vm0, %v1078_v46 }
 0x3a2   :  { %1270 = shalt.err (!%p1267_p4)
}
 0x3a3   :  { %1090 = dma.vmem_to_hbm [thread:$0]  %s1088_s3, 64, %s1919_s12, [#allocation3]  }
 0x3a4   :  { %1279 = dma.done.wait [#allocation3], 64  }
 0x3a5   :  { %1280 = vsyncadd [#allocation3], 4294967232 }
 0x3a6   :  { %1094 = vsyncpa [#allocation3], 1 }

</bundles_post_ra>
